<compile_context>
chip_gen: v7x
topology: tpu7x:2x2x1
jax: 0.10.0
libtpu: 0.0.40
codegen_flags: <defaults>
</compile_context>

<pallas_src>
import jax
import jax.numpy as jnp
from jax.experimental import pallas as pl
from jax.experimental.pallas import tpu as pltpu

_IN = 8                 # input features
_HID = 16               # hidden units
_GROUP = 16             # samples packed per 128-lane row (128 / 8 features)
_LANES = _GROUP * _IN   # 128
_HCOLS = _GROUP * _HID  # 256


def _mlp_kernel(x_ref, w1_ref, b1_ref, w2_ref, b2_ref, o_ref):
    # x_ref : (tr, 128)  16 samples per row, 8 features each (free view of (B, 8))
    # w1_ref: (128, 256) block-diagonal replication of hidden.weight^T (16 copies)
    # b1_ref: (1, 256)   hidden.bias tiled 16x (f32)
    # w2_ref: (256, 16)  block-diagonal replication of output.weight^T (f32)
    # b2_ref: (1, 1)     output.bias (f32)
    # o_ref : (tr, 16)   sample (16*r + j) -> o_ref[r, j]
    h = jnp.dot(x_ref[...], w1_ref[...],
                preferred_element_type=jnp.float32)        # MXU, K=128 / N=256
    h = jnp.maximum(h + b1_ref[...], 0.0)                  # f32 bias + ReLU (VPU)
    y = jnp.dot(h, w2_ref[...],
                preferred_element_type=jnp.float32)        # layer 2 also on the MXU
    o_ref[...] = (y + b2_ref[...]).astype(o_ref.dtype)


def _round_up(a, b):
    return pl.cdiv(a, b) * b


def regression_ann_forward(x, w1, b1, w2, b2, *, block_rows=4096):
    """relu(x @ w1.T + b1) @ w2.T + b2  (PyTorch nn.Linear semantics).

    x : (B, 8) float32 or bfloat16 (bf16 storage halves HBM read traffic;
        accumulation stays f32).
    w1: (16, 8), b1: (16,)   -- nn.Linear(8, 16) parameters (PyTorch layout)
    w2: (1, 16), b2: (1,)    -- nn.Linear(16, 1) parameters (PyTorch layout)
    Returns (B, 1) float32.

    block_rows = batch tile in 128-lane rows (16 samples per row).  Default 4096
    rows = 65536 samples = 2 MiB (f32) x-blocks: on the HBM-roofline plateau while
    the double-buffered footprint fits every generation's VMEM.
    """
    B = x.shape[0]
    in_dtype = x.dtype

    # ---- layout plumbing (free or tiny) ------------------------------------
    # Pad the batch to a multiple of 16 only when needed (rare), then view the
    # contiguous (Bp, 8) buffer as (R, 128).  This replaces the old materialized
    # pad+transpose (an extra full read+write pass over x) with a zero-copy reshape.
    Bp = _round_up(B, _GROUP)
    if Bp != B:
        x = jnp.pad(x, ((0, Bp - B), (0, 0)))   # only hit when B % 16 != 0
    R = Bp // _GROUP
    x2 = x.reshape(R, _LANES)                   # free: row-major contiguous

    # Block-diagonal parameter replication (tiny, built once per call).
    eye = jnp.eye(_GROUP, dtype=jnp.float32)
    # w1bd[8g + k, 16h + n] = (g == h) * w1[n, k]
    w1bd = jnp.einsum("gh,kn->gkhn", eye, w1.astype(jnp.float32).T)
    w1bd = w1bd.reshape(_LANES, _HCOLS).astype(in_dtype)
    b1t = jnp.tile(b1.astype(jnp.float32), _GROUP).reshape(1, _HCOLS)
    # w2bd[16h + n, j] = (h == j) * w2[0, n]
    w2bd = jnp.einsum("hj,n->hnj", eye, w2.astype(jnp.float32).reshape(_HID))
    w2bd = w2bd.reshape(_HCOLS, _GROUP)
    b2c = b2.reshape(1, 1).astype(jnp.float32)

    # Batch tile: multiple of 8 sublanes, clamped for tiny batches.
    tr = max(8, (block_rows // 8) * 8)
    tr = min(tr, _round_up(R, 8))
    grid = (pl.cdiv(R, tr),)   # a ragged final block (if any) is masked by Pallas

    out2 = pl.pallas_call(
        _mlp_kernel,
        out_shape=jax.ShapeDtypeStruct((R, _GROUP), jnp.float32),
        grid=grid,
        in_specs=[
            pl.BlockSpec((tr, _LANES), lambda i: (i, 0)),       # x streamed over batch
            pl.BlockSpec((_LANES, _HCOLS), lambda i: (0, 0)),   # weights stay VMEM-resident
            pl.BlockSpec((1, _HCOLS), lambda i: (0, 0)),
            pl.BlockSpec((_HCOLS, _GROUP), lambda i: (0, 0)),
            pl.BlockSpec((1, 1), lambda i: (0, 0)),
        ],
        out_specs=pl.BlockSpec((tr, _GROUP), lambda i: (i, 0)),
        compiler_params=pltpu.CompilerParams(
            dimension_semantics=("parallel",),   # independent batch tiles
            vmem_limit_bytes=48 * 1024 * 1024,   # > v5e/v6e default scope, < v7x physical
        ),
    )(x2, w1bd, b1t, w2bd, b2c)

    # (R, 16) -> (Bp, 1) is again a free contiguous reshape; drop padded samples.
    return out2.reshape(Bp, 1)[:B]


def init_params(key):
    """Deterministic init matching PyTorch nn.Linear layouts exactly."""
    k1, k2, k3, k4 = jax.random.split(key, 4)
    bound1 = 1.0 / jnp.sqrt(8.0)
    w1 = jax.random.uniform(k1, (16, 8), jnp.float32, -bound1, bound1)   # hidden.weight
    b1 = jax.random.uniform(k2, (16,), jnp.float32, -bound1, bound1)     # hidden.bias
    bound2 = 1.0 / jnp.sqrt(16.0)
    w2 = jax.random.uniform(k3, (1, 16), jnp.float32, -bound2, bound2)   # output.weight
    b2 = jax.random.uniform(k4, (1,), jnp.float32, -bound2, bound2)      # output.bias
    return w1, b1, w2, b2


if __name__ == "__main__":
    key = jax.random.PRNGKey(0)
    kx, kp = jax.random.split(key)

    B = 512  # small demo batch
    x = jax.random.normal(kx, (B, 8), jnp.float32)
    w1, b1, w2, b2 = init_params(kp)

    # Pure-JAX reference of the PyTorch forward.
    ref = jnp.maximum(x @ w1.T + b1, 0.0) @ w2.T + b2

    # Single-tile path (tile clamped to R = 32 rows, grid = 1).
    out = jax.block_until_ready(regression_ann_forward(x, w1, b1, w2, b2))
    assert out.shape == (B, 1)
    assert jnp.allclose(out, ref, atol=1e-5, rtol=1e-5)

    # Multi-step grid path (4 batch tiles of 8 rows = 128 samples, weights resident).
    out_tiled = jax.block_until_ready(
        regression_ann_forward(x, w1, b1, w2, b2, block_rows=8))
    assert out_tiled.shape == (B, 1)
    assert jnp.allclose(out_tiled, ref, atol=1e-5, rtol=1e-5)

    # bf16 input storage (halves the dominant HBM read stream); f32 accumulation,
    # so only the bf16 quantization of x / w1 shows up -> loose tolerance.
    out_bf16 = jax.block_until_ready(
        regression_ann_forward(x.astype(jnp.bfloat16), w1, b1, w2, b2))
    assert out_bf16.shape == (B, 1)
    assert jnp.allclose(out_bf16, ref, atol=5e-2, rtol=5e-2)

    print("KERNEL_OK")
</pallas_src>

<mosaic_0001>
module attributes {stable_mosaic.version = 11 : i64} {
  func.func @_mlp_kernel(%arg0: i32, %arg1: memref<32x128xf32, #tpu.memory_space<vmem>>, %arg2: memref<128x256xf32, #tpu.memory_space<vmem>>, %arg3: memref<1x256xf32, #tpu.memory_space<vmem>>, %arg4: memref<256x16xf32, #tpu.memory_space<vmem>>, %arg5: memref<1x1xf32, #tpu.memory_space<vmem>>, %arg6: memref<32x16xf32, #tpu.memory_space<vmem>>) attributes {dimension_semantics = [#tpu.dimension_semantics<parallel>], iteration_bounds = array<i64: 1>, scalar_prefetch = 0 : i64, scratch_operands = 0 : i64, tpu.core_type = #tpu.core_type<tc>, window_params = [{transform_indices = @transform_0, window_bounds = array<i64: 32, 128>}, {pipeline_mode = #tpu.pipeline_mode<synchronous>, transform_indices = @transform_1, window_bounds = array<i64: 128, 256>}, {pipeline_mode = #tpu.pipeline_mode<synchronous>, transform_indices = @transform_2, window_bounds = array<i64: 1, 256>}, {pipeline_mode = #tpu.pipeline_mode<synchronous>, transform_indices = @transform_3, window_bounds = array<i64: 256, 16>}, {pipeline_mode = #tpu.pipeline_mode<synchronous>, transform_indices = @transform_4, window_bounds = array<i64: 1, 1>}, {transform_indices = @transform_5, window_bounds = array<i64: 32, 16>}]} {
    %c0 = arith.constant 0 : index
    %c0_0 = arith.constant 0 : index
    %0 = vector.load %arg1[%c0, %c0_0] : memref<32x128xf32, #tpu.memory_space<vmem>>, vector<32x128xf32>
    %c0_1 = arith.constant 0 : index
    %c0_2 = arith.constant 0 : index
    %1 = vector.load %arg2[%c0_1, %c0_2] : memref<128x256xf32, #tpu.memory_space<vmem>>, vector<128x256xf32>
    %cst = arith.constant dense<0.000000e+00> : vector<32x256xf32>
    %2 = tpu.matmul %0, %1, %cst {dimension_numbers = #tpu.dot_dimension_numbers<[1], [0], [0], [1], [0, 0, 1, 1], [], []>} : vector<32x128xf32>, vector<128x256xf32>, vector<32x256xf32> -> vector<32x256xf32>
    %c0_3 = arith.constant 0 : index
    %c0_4 = arith.constant 0 : index
    %3 = vector.load %arg3[%c0_3, %c0_4] : memref<1x256xf32, #tpu.memory_space<vmem>>, vector<1x256xf32>
    %4 = vector.broadcast %3 : vector<1x256xf32> to vector<32x256xf32>
    %5 = arith.addf %2, %4 : vector<32x256xf32>
    %cst_5 = arith.constant 0.000000e+00 : f32
    %6 = vector.broadcast %cst_5 : f32 to vector<32x256xf32>
    %7 = arith.maximumf %5, %6 : vector<32x256xf32>
    %c0_6 = arith.constant 0 : index
    %c0_7 = arith.constant 0 : index
    %8 = vector.load %arg4[%c0_6, %c0_7] : memref<256x16xf32, #tpu.memory_space<vmem>>, vector<256x16xf32>
    %cst_8 = arith.constant dense<0.000000e+00> : vector<32x16xf32>
    %9 = tpu.matmul %7, %8, %cst_8 {dimension_numbers = #tpu.dot_dimension_numbers<[1], [0], [0], [1], [0, 0, 1, 1], [], []>} : vector<32x256xf32>, vector<256x16xf32>, vector<32x16xf32> -> vector<32x16xf32>
    %c0_9 = arith.constant 0 : index
    %c0_10 = arith.constant 0 : index
    %10 = vector.load %arg5[%c0_9, %c0_10] : memref<1x1xf32, #tpu.memory_space<vmem>>, vector<1x1xf32>
    %11 = vector.broadcast %10 : vector<1x1xf32> to vector<32x16xf32>
    %12 = arith.addf %9, %11 : vector<32x16xf32>
    %c0_11 = arith.constant 0 : index
    %c0_12 = arith.constant 0 : index
    %13 = vector.load %arg6[%c0_11, %c0_12] : memref<32x16xf32, #tpu.memory_space<vmem>>, vector<32x16xf32>
    tpu.vector_store %arg6[%c0_11, %c0_12], %12 {strides = array<i32>} : memref<32x16xf32, #tpu.memory_space<vmem>>, vector<32x16xf32>,
    return
  }
  func.func @transform_0(%arg0: i32) -> (i32, i32) {
    %c0_i32 = arith.constant 0 : i32
    %c0_i32_0 = arith.constant 0 : i32
    return %arg0, %c0_i32 : i32, i32
  }
  func.func @transform_1(%arg0: i32) -> (i32, i32) {
    %c0_i32 = arith.constant 0 : i32
    %c0_i32_0 = arith.constant 0 : i32
    %c0_i32_1 = arith.constant 0 : i32
    return %c0_i32, %c0_i32_0 : i32, i32
  }
  func.func @transform_2(%arg0: i32) -> (i32, i32) {
    %c0_i32 = arith.constant 0 : i32
    %c0_i32_0 = arith.constant 0 : i32
    %c0_i32_1 = arith.constant 0 : i32
    return %c0_i32, %c0_i32_0 : i32, i32
  }
  func.func @transform_3(%arg0: i32) -> (i32, i32) {
    %c0_i32 = arith.constant 0 : i32
    %c0_i32_0 = arith.constant 0 : i32
    %c0_i32_1 = arith.constant 0 : i32
    return %c0_i32, %c0_i32_0 : i32, i32
  }
  func.func @transform_4(%arg0: i32) -> (i32, i32) {
    %c0_i32 = arith.constant 0 : i32
    %c0_i32_0 = arith.constant 0 : i32
    %c0_i32_1 = arith.constant 0 : i32
    return %c0_i32, %c0_i32_0 : i32, i32
  }
  func.func @transform_5(%arg0: i32) -> (i32, i32) {
    %c0_i32 = arith.constant 0 : i32
    %c0_i32_0 = arith.constant 0 : i32
    return %arg0, %c0_i32 : i32, i32
  }
}

</mosaic_0001>

<bundles_post_ra>
// kernel: tpu_custom_call.1
= control target key start
LH: loop header
LB: loop body
LE: loop exit
PB: predicated region body
PF: predicated region fallthrough
CT: control target
= control target key end

     0   :  { %v415_v3 = vmov 0.0   ;;  %vm294_vm0 = vcmask 130048   ;;  %s677_s1 = inlined_call_operand.vmem [shape: f32[128,256], index: 1, kind: input, shape index: {}]   ;;  %s678_s3 = inlined_call_operand.vmem [shape: f32[256,16], index: 3, kind: input, shape index: {}]   ;;  %s679_s0 = inlined_call_operand.vmem [shape: f32[32,128], index: 0, kind: input, shape index: {}]   ;;  %s680_s4 = inlined_call_operand.<no memory space> [shape: f32[1,1], index: 4, kind: input, shape index: {}]   ;;  %s681_s2 = inlined_call_operand.vmem [shape: f32[1,256], index: 2, kind: input, shape index: {}]   ;;  %s682_s5 = inlined_call_operand.vmem [shape: f32[32,16], index: 5, kind: output, shape index: {}]  }
   0x1   :  { %v27_v0 = vld [vmem:[%s677_s1 + $0x8] sm:$0xff]  ;;  %v29_v1 = vld [vmem:[%s677_s1 + $0x18] sm:$0xff]  ;;  %v26_v2 = vld [vmem:[%s677_s1] sm:$0xff]  ;;  %134 = vmatprep.mubr.f32.mxu0 %v415_v3 }
   0x2   :  { %v348_v4 = vpack.c.bf16 %v29_v1, %v27_v0  ;;  %v28_v5 = vld [vmem:[%s677_s1 + $0x10] sm:$0xff]  ;;  %v31_v6 = vld [vmem:[%s677_s1 + $0x28] sm:$0xff]  ;;  %v33_v7 = vld [vmem:[%s677_s1 + $0x38] sm:$0xff] }
   0x3   :  { %v350_v8 = vpack.c.bf16 %v28_v5, %v26_v2  ;;  %v352_v9 = vpack.c.bf16 %v33_v7, %v31_v6  ;;  %v30_v10 = vld [vmem:[%s677_s1 + $0x20] sm:$0xff]  ;;  %v32_v11 = vld [vmem:[%s677_s1 + $0x30] sm:$0xff]  ;;  %v35_v12 = vld [vmem:[%s677_s1 + $0x48] sm:$0xff] }
   0x4   :  { %349 = vmatprep.subr.bf16.mxu0 %v348_v4  ;;  %v37_v13 = vld [vmem:[%s677_s1 + $0x58] sm:$0xff]  ;;  %v354_v14 = vpack.c.bf16 %v32_v11, %v30_v10  ;;  %v34_v16 = vld [vmem:[%s677_s1 + $0x40] sm:$0xff]  ;;  %v36_v17 = vld [vmem:[%s677_s1 + $0x50] sm:$0xff] }
   0x5   :  { %351 = vmatpush1.bf16.msra.mxu0 %v350_v8  ;;  %v356_v15 = vpack.c.bf16 %v37_v13, %v35_v12  ;;  %v39_v18 = vld [vmem:[%s677_s1 + $0x68] sm:$0xff]  ;;  %v41_v19 = vld [vmem:[%s677_s1 + $0x78] sm:$0xff]  ;;  %v358_v20 = vpack.c.bf16 %v36_v17, %v34_v16  ;;  %v38_v22 = vld [vmem:[%s677_s1 + $0x60] sm:$0xff] }
   0x6   :  { %353 = vmatprep.subr.bf16.mxu0 %v352_v9  ;;  %v360_v21 = vpack.c.bf16 %v41_v19, %v39_v18  ;;  %v40_v23 = vld [vmem:[%s677_s1 + $0x70] sm:$0xff]  ;;  %v43_v24 = vld [vmem:[%s677_s1 + $0x88] sm:$0xff]  ;;  %v45_v25 = vld [vmem:[%s677_s1 + $0x98] sm:$0xff] }
   0x7   :  { %v42_v26 = vld [vmem:[%s677_s1 + $0x80] sm:$0xff]  ;;  %v44_v27 = vld [vmem:[%s677_s1 + $0x90] sm:$0xff]  ;;  %v362_v28 = vpack.c.bf16 %v40_v23, %v38_v22  ;;  %v47_v29 = vld [vmem:[%s677_s1 + $0xa8] sm:$0xff]  ;;  %v364_v34 = vpack.c.bf16 %v45_v25, %v43_v24 }
   0x8   :  { %v49_v30 = vld [vmem:[%s677_s1 + $0xb8] sm:$0xff]  ;;  %v183_v31 = vld [vmem:[%s678_s3 + $0x80] sm:$0xff]  ;;  %v184_v32 = vld [vmem:[%s678_s3 + $0x88] sm:$0xff]  ;;  %v366_v45 = vpack.c.bf16 %v44_v27, %v42_v26 }
   0x9   :  { %355 = vmatpush1.bf16.msra.mxu0 %v354_v14  ;;  %v167_v33 = vld [vmem:[%s678_s3] sm:$0xff]  ;;  %v380_v35 = vpack.c.bf16 %v184_v32, %v183_v31  ;;  %v168_v36 = vld [vmem:[%s678_s3 + $0x8] sm:$0xff]  ;;  %v185_v37 = vld [vmem:[%s678_s3 + $0x90] sm:$0xff]  ;;  %v368_v49 = vpack.c.bf16 %v49_v30, %v47_v29 }
   0xa   :  { %357 = vmatprep.subr.bf16.mxu0 %v356_v15  ;;  %v186_v38 = vld [vmem:[%s678_s3 + $0x98] sm:$0xff]  ;;  %v382_v39 = vpack.c.bf16 %v168_v36, %v167_v33  ;;  %v169_v41 = vld [vmem:[%s678_s3 + $0x10] sm:$0xff]  ;;  %v187_v43 = vld [vmem:[%s678_s3 + $0xa0] sm:$0xff] }
   0xb   :  { %v384_v40 = vpack.c.bf16 %v186_v38, %v185_v37  ;;  %v170_v42 = vld [vmem:[%s678_s3 + $0x18] sm:$0xff]  ;;  %381 = vmatprep.subr.bf16.mxu1 %v380_v35  ;;  %v188_v44 = vld [vmem:[%s678_s3 + $0xa8] sm:$0xff]  ;;  %v46_v46 = vld [vmem:[%s677_s1 + $0xa0] sm:$0xff]  ;;  %v416_v37 = vmov 0   ;;  %v10_v38 = vstv %s680_s4 }
   0xc   :  { %v48_v47 = vld [vmem:[%s677_s1 + $0xb0] sm:$0xff]  ;;  %383 = vmatpush3.bf16.msra.mxu1 %v382_v39  ;;  %v386_v48 = vpack.c.bf16 %v170_v42, %v169_v41  ;;  %v51_v50 = vld [vmem:[%s677_s1 + $0xc8] sm:$0xff]  ;;  %v388_v51 = vpack.c.bf16 %v188_v44, %v187_v43  ;;  %v171_v52 = vld [vmem:[%s678_s3 + $0x20] sm:$0xff]  ;;  %414 = vset.pattern.permute.xlu0 %v416_v37  ;;  %11 = vst [vmem:[#allocation2] sm:$0x1] %v10_v38 }
   0xd   :  { %359 = vmatpush1.bf16.msra.mxu0 %v358_v20  ;;  %385 = vmatprep.subr.bf16.mxu1 %v384_v40  ;;  %v172_v53 = vld [vmem:[%s678_s3 + $0x28] sm:$0xff]  ;;  %v53_v54 = vld [vmem:[%s677_s1 + $0xd8] sm:$0xff]  ;;  %v189_v55 = vld [vmem:[%s678_s3 + $0xb0] sm:$0xff]  ;;  %v370_v57 = vpack.c.bf16 %v48_v47, %v46_v46  ;;  %v60_v40 = vlaneseq }
   0xe   :  { %361 = vmatprep.subr.bf16.mxu0 %v360_v21  ;;  %v190_v56 = vld [vmem:[%s678_s3 + $0xb8] sm:$0xff]  ;;  %v50_v58 = vld [vmem:[%s677_s1 + $0xc0] sm:$0xff]  ;;  %v52_v59 = vld [vmem:[%s677_s1 + $0xd0] sm:$0xff]  ;;  %v390_v60 = vpack.c.bf16 %v172_v53, %v171_v52  ;;  %v372_v61 = vpack.c.bf16 %v53_v54, %v51_v50 }
   0xf   :  { %v55_v62 = vld [vmem:[%s677_s1 + $0xe8] sm:$0xff]  ;;  %v392_v63 = vpack.c.bf16 %v190_v56, %v189_v55  ;;  %v173_v0 = vld [vmem:[%s678_s3 + $0x30] sm:$0xff]  ;;  %v174_v1 = vld [vmem:[%s678_s3 + $0x38] sm:$0xff]  ;;  %v374_v6 = vpack.c.bf16 %v52_v59, %v50_v58  ;;  %v61_v41 = vshrl.u32 %v60_v40, 7 }
  0x10   :  { %387 = vmatpush3.bf16.msra.mxu1 %v386_v48  ;;  %v57_v2 = vld [vmem:[%s677_s1 + $0xf8] sm:$0xff]  ;;  %v191_v4 = vld [vmem:[%s678_s3 + $0xc0] sm:$0xff]  ;;  %v192_v5 = vld [vmem:[%s678_s3 + $0xc8] sm:$0xff]  ;;  %v394_v8 = vpack.c.bf16 %v174_v1, %v173_v0 }
  0x11   :  { %363 = vmatpush1.bf16.msra.mxu0 %v362_v28  ;;  %389 = vmatprep.subr.bf16.mxu1 %v388_v51  ;;  %v54_v7 = vld [vmem:[%s677_s1 + $0xe0] sm:$0xff]  ;;  %v376_v9 = vpack.c.bf16 %v57_v2, %v55_v62  ;;  %v56_v10 = vld [vmem:[%s677_s1 + $0xf0] sm:$0xff]  ;;  %v396_v11 = vpack.c.bf16 %v192_v5, %v191_v4  ;;  %v176_v13 = vld [vmem:[%s678_s3 + $0x48] sm:$0xff]  ;;  %v62_v42 = vsub.s32 0, %v61_v41  ;;  %v66_v44 = vsub.s32 1, %v61_v41 }
  0x12   :  { %365 = vmatprep.subr.bf16.mxu0 %v364_v34  ;;  %v175_v12 = vld [vmem:[%s678_s3 + $0x40] sm:$0xff]  ;;  %v193_v14 = vld [vmem:[%s678_s3 + $0xd0] sm:$0xff]  ;;  %v194_v15 = vld [vmem:[%s678_s3 + $0xd8] sm:$0xff]  ;;  %v378_v16 = vpack.c.bf16 %v56_v10, %v54_v7 }
  0x13   :  { %v398_v17 = vpack.c.bf16 %v176_v13, %v175_v12  ;;  %v400_v18 = vpack.c.bf16 %v194_v15, %v193_v14  ;;  %v177_v19 = vld [vmem:[%s678_s3 + $0x50] sm:$0xff]  ;;  %v178_v20 = vld [vmem:[%s678_s3 + $0x58] sm:$0xff]  ;;  %v195_v21 = vld [vmem:[%s678_s3 + $0xe0] sm:$0xff] }
  0x14   :  { %391 = vmatpush3.bf16.msra.mxu1 %v390_v60  ;;  %v196_v22 = vld [vmem:[%s678_s3 + $0xe8] sm:$0xff]  ;;  %v22_v23 = vld [vmem:[%s679_s0] sm:$0xff]  ;;  %v402_v24 = vpack.c.bf16 %v178_v20, %v177_v19  ;;  %v24_v27 = vld [vmem:[%s679_s0 + $0x10] sm:$0xff] }
  0x15   :  { %367 = vmatpush1.bf16.msra.mxu0 %v366_v45  ;;  %393 = vmatprep.subr.bf16.mxu1 %v392_v63  ;;  %v404_v25 = vpack.c.bf16 %v196_v22, %v195_v21  ;;  %v23_v26 = vld [vmem:[%s679_s0 + $0x8] sm:$0xff]  ;;  %v25_v28 = vld [vmem:[%s679_s0 + $0x18] sm:$0xff]  ;;  %v179_v29 = vld [vmem:[%s678_s3 + $0x60] sm:$0xff] }
  0x16   :  { %369 = vmatprep.subr.bf16.mxu0 %v368_v49  ;;  %v180_v30 = vld [vmem:[%s678_s3 + $0x68] sm:$0xff]  ;;  %v197_v32 = vld [vmem:[%s678_s3 + $0xf0] sm:$0xff]  ;;  %v182_v35 = vld [vmem:[%s678_s3 + $0x78] sm:$0xff] }
  0x17   :  { %v406_v31 = vpack.c.bf16 %v180_v30, %v179_v29  ;;  %v181_v34 = vld [vmem:[%s678_s3 + $0x70] sm:$0xff]  ;;  %v303_v39 = vld [vmem:[#allocation2] ss:$0 sm:$0xff] }
  0x18   :  { %395 = vmatpush3.bf16.msra.mxu1 %v394_v8  ;;  %v410_v36 = vpack.c.bf16 %v182_v35, %v181_v34  ;;  %206 = vperm.xlu0 %414, %v303_v39   ;;  %v58_v43 = vld [vmem:[%s681_s2] sm:$0x3] }
  0x19   :  { %371 = vmatpush1.bf16.msra.mxu0 %v370_v57  ;;  %397 = vmatprep.subr.bf16.mxu1 %v396_v11  ;;  %v63_v45 = vrot.slane %v58_v43, %v62_v42  ;;  %v67_v46 = vrot.slane %v58_v43, %v66_v44 }
  0x1a   :  { %373 = vmatprep.subr.bf16.mxu0 %v372_v61 }
  0x1c   :  { %399 = vmatpush3.bf16.msra.mxu1 %v398_v17 }
  0x1d   :  { %375 = vmatpush1.bf16.msra.mxu0 %v374_v6  ;;  %401 = vmatprep.subr.bf16.mxu1 %v400_v18 }
  0x1e   :  { %377 = vmatprep.subr.bf16.mxu0 %v376_v9 }
  0x20   :  { %403 = vmatpush3.bf16.msra.mxu1 %v402_v24 }
  0x21   :  { %379 = vmatpush1.bf16.msra.mxu0 %v378_v16  ;;  %405 = vmatprep.subr.bf16.mxu1 %v404_v25 }
  0x24   :  { %135 = vmatmul.mubr.f32.vlgmr.msra.gmra.mrb[0].mxu0 %v22_v23  ;;  %407 = vmatpush3.bf16.msra.mxu1 %v406_v31 }
  0x25   :  { %140 = vmatprep.mubr.f32.mxu0 %v415_v3 }
  0x28   :  { %141 = vmatmul.mubr.f32.gmra.mrb[2].mxu0 %v23_v26 }
  0x29   :  { %146 = vmatprep.mubr.f32.mxu0 %v415_v3 }
  0x2c   :  { %147 = vmatmul.mubr.f32.gmra.mrb[4].mxu0 %v24_v27 }
  0x2d   :  { %152 = vmatprep.mubr.f32.mxu0 %v415_v3  ;;  %v198_v3 = vld [vmem:[%s678_s3 + $0xf8] sm:$0xff] }
  0x2e   :  { %v408_v33 = vpack.c.bf16 %v198_v3, %v197_v32 }
  0x30   :  { %153 = vmatmul.mubr.f32.gmra.mrb[6].mxu0 %v25_v28  ;;  %409 = vmatprep.subr.bf16.mxu1 %v408_v33 }
  0x31   :  { %411 = vmatpush3.bf16.msra.mxu1 %v410_v36 }
  0x97   :  { %v207_v10 = vpop.permute.xlu0 %206 }
  0xf7   :  { %v136_v47 = vpop.f32.mrb[0].mxu0 }
  0xf8   :  { %v137_v48 = vadd.f32 %v136_v47, %v63_v45  ;;  %v138_v49 = vpop.f32.mrb[1].mxu0 }
  0xf9   :  { %v139_v50 = vadd.f32 %v138_v49, %v67_v46 }
  0xfa   :  { %v159_v53 = vmax.f32 %v137_v48, 0.0 }
  0xfb   :  { %v142_v51 = vpop.f32.mrb[2].mxu0  ;;  %v160_v52 = vmax.f32 %v139_v50, 0.0 }
  0xfc   :  { %v143_v54 = vadd.f32 %v142_v51, %v63_v45  ;;  %v144_v55 = vpop.f32.mrb[3].mxu0 }
  0xfd   :  { %v145_v56 = vadd.f32 %v144_v55, %v67_v46  ;;  %273 = vmatprep.mubr.f32.mxu1 %v160_v52 }
  0xfe   :  { %274 = vmatmul.mubr.f32.vlgmr.msra.gmra.mrb[0].mxu1 %v159_v53  ;;  %v161_v59 = vmax.f32 %v143_v54, 0.0 }
  0xff   :  { %v162_v57 = vmax.f32 %v145_v56, 0.0  ;;  %v148_v58 = vpop.f32.mrb[4].mxu0 }
 0x100   :  { %v149_v60 = vadd.f32 %v148_v58, %v63_v45  ;;  %v150_v61 = vpop.f32.mrb[5].mxu0 }
 0x101   :  { %v151_v62 = vadd.f32 %v150_v61, %v67_v46  ;;  %278 = vmatprep.mubr.f32.mxu1 %v162_v57 }
 0x102   :  { %279 = vmatmul.mubr.f32.gmra.mrb[2].mxu1 %v161_v59  ;;  %v163_v1 = vmax.f32 %v149_v60, 0.0 }
 0x103   :  { %v164_v63 = vmax.f32 %v151_v62, 0.0  ;;  %v154_v0 = vpop.f32.mrb[6].mxu0 }
 0x104   :  { %v155_v2 = vadd.f32 %v154_v0, %v63_v45  ;;  %v156_v4 = vpop.f32.mrb[7].mxu0 }
 0x105   :  { %v157_v5 = vadd.f32 %v156_v4, %v67_v46  ;;  %283 = vmatprep.mubr.f32.mxu1 %v164_v63 }
 0x106   :  { %284 = vmatmul.mubr.f32.gmra.mrb[4].mxu1 %v163_v1  ;;  %v165_v7 = vmax.f32 %v155_v2, 0.0 }
 0x107   :  { %v166_v6 = vmax.f32 %v157_v5, 0.0 }
 0x109   :  { %288 = vmatprep.mubr.f32.mxu1 %v166_v6 }
 0x10a   :  { %289 = vmatmul.mubr.f32.gmra.mrb[6].mxu1 %v165_v7 }
 0x1d1   :  { %v336_v8 = vpop.f32.mrb[0].mxu1 }
 0x1d2   :  { %v337_v9 = vpop.f32.mrb[1].mxu1 }
 0x1d3   :  { %v338_v11 = vadd.f32 %v337_v9, %v336_v8 }
 0x1d5   :  { %v276_v12 = vadd.f32 %v338_v11, %v207_v10  ;;  %v339_v13 = vpop.f32.mrb[2].mxu1 }
 0x1d6   :  { %v340_v14 = vpop.f32.mrb[3].mxu1 }
 0x1d7   :  { %295 = vst.msk [vmem:[%s682_s5] sm:$0xff] %vm294_vm0, %v276_v12  ;;  %v341_v15 = vadd.f32 %v340_v14, %v339_v13 }
 0x1d9   :  { %v281_v16 = vadd.f32 %v341_v15, %v207_v10  ;;  %v342_v17 = vpop.f32.mrb[4].mxu1 }
 0x1da   :  { %v343_v18 = vpop.f32.mrb[5].mxu1 }
 0x1db   :  { %296 = vst.msk [vmem:[%s682_s5 + $0x8] sm:$0xff] %vm294_vm0, %v281_v16  ;;  %v344_v19 = vadd.f32 %v343_v18, %v342_v17 }
 0x1dd   :  { %v286_v20 = vadd.f32 %v344_v19, %v207_v10  ;;  %v345_v21 = vpop.f32.mrb[6].mxu1 }
 0x1de   :  { %v346_v22 = vpop.f32.mrb[7].mxu1 }
 0x1df   :  { %297 = vst.msk [vmem:[%s682_s5 + $0x10] sm:$0xff] %vm294_vm0, %v286_v20  ;;  %v347_v23 = vadd.f32 %v346_v22, %v345_v21 }
 0x1e1   :  { %v291_v24 = vadd.f32 %v347_v23, %v207_v10 }
 0x1e3   :  { %298 = vst.msk [vmem:[%s682_s5 + $0x18] sm:$0xff] %vm294_vm0, %v291_v24 }

</bundles_post_ra>
